<compile_context>
chip_gen: v7x
topology: tpu7x:2x2x1
jax: 0.10.0
libtpu: 0.0.40
codegen_flags: <defaults>
</compile_context>

<pallas_src>
import jax
import jax.numpy as jnp
from jax.experimental import pallas as pl
from jax.experimental.pallas import tpu as pltpu

_LANE = 512            # lane-dense last dim (multiple of 128)
_MAX_TILE_R = 1024     # 3 * 1024 * 512 * 4 B = 6 MiB per array per block
_TARGET_STEPS = 4      # keep the pipeline >= ~4 grid steps when possible


def _tonemap_hsv2rgb_kernel(hsv_ref, rgb_ref):
    # hsv_ref / rgb_ref: (3, TILE_R, LANE) VMEM tiles (channel planes).
    h = hsv_ref[0]                              # hue (unchanged)
    s = hsv_ref[1] * 0.6                        # hdr_h[1] *= 0.6
    # clamp(295*v+5, 5, 300) -> (v-5)/295  ==  clip(v, 0, 1)
    v = jnp.clip(hsv_ref[2], 0.0, 1.0)
    # pow(v, 1/2.2) as exp/log -> EUP slot; max() guards log(0) (also covers
    # the garbage region of a ragged final block — writes there are masked).
    v = jnp.exp((1.0 / 2.2) * jnp.log(jnp.maximum(v, 1e-30)))

    # hsv2rgb_torch (value channel = v), arithmetic form:
    #   k = (n + 6h) mod 6,  out = v - c * clip(min(k, 4-k), 0, 1)
    # Equivalent to the sector/where form for h >= 0 (torch uint8 trunc ==
    # floor there; sigmoid-produced hue is always >= 0).
    c = v * s
    m6 = jnp.mod(h * 6.0, 6.0)                  # computed once, shared

    def chan(n):
        k = m6 + n
        k = jnp.where(k >= 6.0, k - 6.0, k)     # single wrap (m6 < 6, n <= 5)
        w = 2.0 - jnp.abs(k - 2.0)              # == min(k, 4 - k)
        return v - c * jnp.clip(w, 0.0, 1.0)

    rgb_ref[0] = chan(5.0)
    rgb_ref[1] = chan(3.0)
    rgb_ref[2] = chan(1.0)


def _round_up(x, m):
    return ((x + m - 1) // m) * m


def _pick_tile_r(rows):
    if rows <= 8:
        return rows                              # full-extent (tiny image)
    t = _round_up(pl.cdiv(rows, _TARGET_STEPS), 8)
    return max(8, min(_MAX_TILE_R, t))


def tonemap_hsv2rgb_from_batch(ldr_hat):
    """ldr_hat: (B, 3, H, W) -> (3, H, W) tone-mapped, gamma'd float32 RGB
    computed from batch item 0 (the slice never materializes in HBM)."""
    B, C, H, W = ldr_hat.shape
    assert C == 3
    ldr_hat = ldr_hat.astype(jnp.float32)
    P = H * W

    if P % _LANE == 0:
        # Common case: free contiguous reshape, no pad, no trailing slice.
        rows = P // _LANE
        tile_r = _pick_tile_r(rows)
        slab = ldr_hat.reshape(B, 3, rows, _LANE)          # bitcast (free)
        in_spec = pl.BlockSpec((pl.Squeezed(), 3, tile_r, _LANE),
                               lambda i: (0, 0, i, 0))     # pin batch block 0
    else:
        # Rare fallback: pad the flattened plane up to the next lane multiple.
        rows = pl.cdiv(P, _LANE)
        tile_r = _pick_tile_r(rows)
        flat = ldr_hat[0].reshape(3, P)
        flat = jnp.pad(flat, ((0, 0), (0, rows * _LANE - P)))
        slab = flat.reshape(3, rows, _LANE)
        in_spec = pl.BlockSpec((3, tile_r, _LANE), lambda i: (0, i, 0))

    out_spec = pl.BlockSpec((3, tile_r, _LANE), lambda i: (0, i, 0))
    grid = (pl.cdiv(rows, tile_r),)                        # ragged last block ok

    out = pl.pallas_call(
        _tonemap_hsv2rgb_kernel,
        out_shape=jax.ShapeDtypeStruct((3, rows, _LANE), jnp.float32),
        grid_spec=pltpu.PrefetchScalarGridSpec(
            num_scalar_prefetch=0,
            grid=grid,
            in_specs=[in_spec],
            out_specs=out_spec,
        ),
        compiler_params=pltpu.CompilerParams(
            dimension_semantics=("parallel",),
            allow_input_fusion=[True],
            vmem_limit_bytes=48 * 1024 * 1024,
        ),
        cost_estimate=pl.CostEstimate(
            flops=30 * P,
            transcendentals=2 * P,
            bytes_accessed=2 * 3 * rows * _LANE * 4,
        ),
    )(slab)

    if rows * _LANE == P:
        return out.reshape(3, H, W)                        # free
    return out.reshape(3, rows * _LANE)[:, :P].reshape(3, H, W)


# ----------------------------------------------------------------------------
# Deterministic stand-ins for the unspecified submodules modelA / modelB.
# ----------------------------------------------------------------------------
def make_modelA_params():
    w = (jnp.arange(9, dtype=jnp.float32).reshape(3, 3) / 10.0) - 0.4
    b = jnp.array([0.1, -0.1, 0.2], dtype=jnp.float32)
    return w, b


def modelA_forward(params, x, smax):
    # TODO(synk): original modelA is an arbitrary learned sub-network; this is
    # a deterministic 1x1-conv + sigmoid stand-in (glue, not the hot path).
    w, b = params
    y = jnp.einsum('oc,bchw->bohw', w, x) + b[None, :, None, None]
    return {'ldr_x_hat': jax.nn.sigmoid(y * smax)}


def modelB_forward(hdr, ldr):
    # TODO(synk): original modelB is an arbitrary learned sub-network; stand-in
    # carries the Pallas-produced ldr plus a scalar comparison with hdr.
    return {'ldr': ldr, 'mse': jnp.mean((hdr - ldr) ** 2)}


# ----------------------------------------------------------------------------
# end2end.forward
# ----------------------------------------------------------------------------
def end2end_forward(modelA_params, x, smax, hdr):
    out_net1 = modelA_forward(modelA_params, x, smax)
    ldr_hat = out_net1['ldr_x_hat']                      # (B, 3, H, W)
    # torch: ldr_out2 built for the whole batch, then .data[0] selects item 0;
    # the batch-0 selection happens inside the pallas_call's index_map.
    ldr = tonemap_hsv2rgb_from_batch(ldr_hat)[None]      # (1, 3, H, W)
    out_net2 = modelB_forward(hdr, ldr)
    return out_net1, out_net2


# ----------------------------------------------------------------------------
# Pure-JAX reference mirroring the torch code op-for-op (sanity check).
# ----------------------------------------------------------------------------
def _reference_ldr(ldr_hat):
    hsv = ldr_hat[0].astype(jnp.float32)
    h, s, v = hsv[0], hsv[1], hsv[2]
    t = jnp.clip(295.0 * v + 5.0, 5.0, 300.0)
    t = (t - 5.0) / 295.0
    t = t ** (1.0 / 2.2)
    s = s * 0.6
    c = t * s
    h6 = h * 6.0
    x = c * (1.0 - jnp.abs(jnp.mod(h6, 2.0) - 1.0))
    m = t - c
    o = jnp.zeros_like(c)
    idx = jnp.floor(h6).astype(jnp.int32) % 6
    conds = [idx == 0, idx == 1, idx == 2, idx == 3, idx == 4]
    r = jnp.select(conds, [c, x, o, o, x], c)
    g = jnp.select(conds, [x, c, c, x, o], o)
    b = jnp.select(conds, [o, o, x, c, c], x)
    return jnp.stack([r + m, g + m, b + m])[None]


if __name__ == "__main__":
    key = jax.random.PRNGKey(0)
    k1, k2, k3, k4 = jax.random.split(key, 4)
    params = make_modelA_params()
    smax = jnp.float32(1.0)

    # Case 1: lane-aligned spatial size (common, zero-copy path).
    B, C, H, W = 2, 3, 64, 64
    x = jax.random.uniform(k1, (B, C, H, W), dtype=jnp.float32)
    hdr = jax.random.uniform(k2, (1, C, H, W), dtype=jnp.float32)
    out_net1, out_net2 = end2end_forward(params, x, smax, hdr)
    jax.block_until_ready(out_net1['ldr_x_hat'])
    ldr = jax.block_until_ready(out_net2['ldr'])
    ref = _reference_ldr(out_net1['ldr_x_hat'])
    assert bool(jnp.allclose(ldr, ref, atol=1e-3, rtol=1e-3)), "mismatch (aligned)"

    # Case 2: non-aligned spatial size (padded fallback path).
    B2, H2, W2 = 1, 40, 36
    x2 = jax.random.uniform(k3, (B2, C, H2, W2), dtype=jnp.float32)
    hdr2 = jax.random.uniform(k4, (1, C, H2, W2), dtype=jnp.float32)
    out_net1b, out_net2b = end2end_forward(params, x2, smax, hdr2)
    ldr2 = jax.block_until_ready(out_net2b['ldr'])
    ref2 = _reference_ldr(out_net1b['ldr_x_hat'])
    assert bool(jnp.allclose(ldr2, ref2, atol=1e-3, rtol=1e-3)), "mismatch (ragged)"

    print("KERNEL_OK")
</pallas_src>

<mosaic_0001>
module attributes {stable_mosaic.version = 11 : i64} {
  func.func @_tonemap_hsv2rgb_kernel(%arg0: i32, %arg1: memref<1x3x8x512xf32, #tpu.memory_space<vmem>>, %arg2: memref<3x8x512xf32, #tpu.memory_space<vmem>>) attributes {dimension_semantics = [#tpu.dimension_semantics<parallel>], iteration_bounds = array<i64: 1>, scalar_prefetch = 0 : i64, scratch_operands = 0 : i64, tpu.core_type = #tpu.core_type<tc>, window_params = [{transform_indices = @transform_0, window_bounds = array<i64: 1, 3, 8, 512>}, {transform_indices = @transform_1, window_bounds = array<i64: 3, 8, 512>}]} {
    %c0 = arith.constant 0 : index
    %c0_0 = arith.constant 0 : index
    %c0_1 = arith.constant 0 : index
    %c0_2 = arith.constant 0 : index
    %0 = vector.load %arg1[%c0, %c0_0, %c0_1, %c0_2] : memref<1x3x8x512xf32, #tpu.memory_space<vmem>>, vector<1x1x8x512xf32>
    %1 = vector.shape_cast %0 : vector<1x1x8x512xf32> to vector<8x512xf32>
    %c0_3 = arith.constant 0 : index
    %c1 = arith.constant 1 : index
    %c0_4 = arith.constant 0 : index
    %c0_5 = arith.constant 0 : index
    %2 = vector.load %arg1[%c0_3, %c1, %c0_4, %c0_5] : memref<1x3x8x512xf32, #tpu.memory_space<vmem>>, vector<1x1x8x512xf32>
    %3 = vector.shape_cast %2 : vector<1x1x8x512xf32> to vector<8x512xf32>
    %cst = arith.constant 6.000000e-01 : f32
    %4 = vector.broadcast %cst : f32 to vector<8x512xf32>
    %5 = arith.mulf %3, %4 : vector<8x512xf32>
    %c0_6 = arith.constant 0 : index
    %c2 = arith.constant 2 : index
    %c0_7 = arith.constant 0 : index
    %c0_8 = arith.constant 0 : index
    %6 = vector.load %arg1[%c0_6, %c2, %c0_7, %c0_8] : memref<1x3x8x512xf32, #tpu.memory_space<vmem>>, vector<1x1x8x512xf32>
    %7 = vector.shape_cast %6 : vector<1x1x8x512xf32> to vector<8x512xf32>
    %cst_9 = arith.constant 0.000000e+00 : f32
    %cst_10 = arith.constant 1.000000e+00 : f32
    %8 = vector.broadcast %cst_9 : f32 to vector<8x512xf32>
    %9 = arith.maximumf %8, %7 : vector<8x512xf32>
    %10 = vector.broadcast %cst_10 : f32 to vector<8x512xf32>
    %11 = arith.minimumf %10, %9 : vector<8x512xf32>
    %cst_11 = arith.constant 1.000000e-30 : f32
    %12 = vector.broadcast %cst_11 : f32 to vector<8x512xf32>
    %13 = arith.maximumf %11, %12 : vector<8x512xf32>
    %14 = math.log %13 : vector<8x512xf32>
    %cst_12 = arith.constant 0.454545468 : f32
    %15 = vector.broadcast %cst_12 : f32 to vector<8x512xf32>
    %16 = arith.mulf %15, %14 : vector<8x512xf32>
    %17 = math.exp %16 : vector<8x512xf32>
    %18 = arith.mulf %17, %5 : vector<8x512xf32>
    %cst_13 = arith.constant 6.000000e+00 : f32
    %19 = vector.broadcast %cst_13 : f32 to vector<8x512xf32>
    %20 = arith.mulf %1, %19 : vector<8x512xf32>
    %cst_14 = arith.constant 6.000000e+00 : f32
    %21 = vector.broadcast %cst_14 : f32 to vector<8x512xf32>
    %22 = arith.remf %20, %21 : vector<8x512xf32>
    %cst_15 = arith.constant 0.000000e+00 : f32
    %23 = vector.broadcast %cst_15 : f32 to vector<8x512xf32>
    %24 = arith.cmpf one, %22, %23 : vector<8x512xf32>
    %cst_16 = arith.constant 0.000000e+00 : f32
    %25 = vector.broadcast %cst_16 : f32 to vector<8x512xf32>
    %26 = arith.cmpf olt, %22, %25 : vector<8x512xf32>
    %cst_17 = arith.constant 0.000000e+00 : f32
    %27 = arith.cmpf olt, %cst_14, %cst_17 : f32
    %28 = vector.broadcast %27 : i1 to vector<8x512xi1>
    %29 = vector.broadcast %28 : vector<8x512xi1> to vector<8x512xi1>
    %30 = arith.xori %26, %29 : vector<8x512xi1>
    %31 = arith.andi %30, %24 : vector<8x512xi1>
    %32 = vector.broadcast %cst_14 : f32 to vector<8x512xf32>
    %33 = arith.addf %22, %32 : vector<8x512xf32>
    %34 = arith.select %31, %33, %22 : vector<8x512xi1>, vector<8x512xf32>
    %cst_18 = arith.constant 5.000000e+00 : f32
    %35 = vector.broadcast %cst_18 : f32 to vector<8x512xf32>
    %36 = arith.addf %34, %35 : vector<8x512xf32>
    %cst_19 = arith.constant 6.000000e+00 : f32
    %37 = vector.broadcast %cst_19 : f32 to vector<8x512xf32>
    %38 = arith.cmpf oge, %36, %37 : vector<8x512xf32>
    %cst_20 = arith.constant 6.000000e+00 : f32
    %39 = vector.broadcast %cst_20 : f32 to vector<8x512xf32>
    %40 = arith.subf %36, %39 : vector<8x512xf32>
    %41 = arith.select %38, %40, %36 : vector<8x512xi1>, vector<8x512xf32>
    %cst_21 = arith.constant 2.000000e+00 : f32
    %42 = vector.broadcast %cst_21 : f32 to vector<8x512xf32>
    %43 = arith.subf %41, %42 : vector<8x512xf32>
    %44 = math.absf %43 : vector<8x512xf32>
    %cst_22 = arith.constant 2.000000e+00 : f32
    %45 = vector.broadcast %cst_22 : f32 to vector<8x512xf32>
    %46 = arith.subf %45, %44 : vector<8x512xf32>
    %cst_23 = arith.constant 0.000000e+00 : f32
    %cst_24 = arith.constant 1.000000e+00 : f32
    %47 = vector.broadcast %cst_23 : f32 to vector<8x512xf32>
    %48 = arith.maximumf %47, %46 : vector<8x512xf32>
    %49 = vector.broadcast %cst_24 : f32 to vector<8x512xf32>
    %50 = arith.minimumf %49, %48 : vector<8x512xf32>
    %51 = arith.mulf %18, %50 : vector<8x512xf32>
    %52 = arith.subf %17, %51 : vector<8x512xf32>
    %c0_25 = arith.constant 0 : index
    %c0_26 = arith.constant 0 : index
    %c0_27 = arith.constant 0 : index
    %53 = vector.load %arg2[%c0_25, %c0_26, %c0_27] : memref<3x8x512xf32, #tpu.memory_space<vmem>>, vector<1x8x512xf32>
    %54 = vector.shape_cast %53 : vector<1x8x512xf32> to vector<8x512xf32>
    %55 = vector.shape_cast %52 : vector<8x512xf32> to vector<1x8x512xf32>
    tpu.vector_store %arg2[%c0_25, %c0_26, %c0_27], %55 {strides = array<i32>} : memref<3x8x512xf32, #tpu.memory_space<vmem>>, vector<1x8x512xf32>,
    %cst_28 = arith.constant 3.000000e+00 : f32
    %56 = vector.broadcast %cst_28 : f32 to vector<8x512xf32>
    %57 = arith.addf %34, %56 : vector<8x512xf32>
    %cst_29 = arith.constant 6.000000e+00 : f32
    %58 = vector.broadcast %cst_29 : f32 to vector<8x512xf32>
    %59 = arith.cmpf oge, %57, %58 : vector<8x512xf32>
    %cst_30 = arith.constant 6.000000e+00 : f32
    %60 = vector.broadcast %cst_30 : f32 to vector<8x512xf32>
    %61 = arith.subf %57, %60 : vector<8x512xf32>
    %62 = arith.select %59, %61, %57 : vector<8x512xi1>, vector<8x512xf32>
    %cst_31 = arith.constant 2.000000e+00 : f32
    %63 = vector.broadcast %cst_31 : f32 to vector<8x512xf32>
    %64 = arith.subf %62, %63 : vector<8x512xf32>
    %65 = math.absf %64 : vector<8x512xf32>
    %cst_32 = arith.constant 2.000000e+00 : f32
    %66 = vector.broadcast %cst_32 : f32 to vector<8x512xf32>
    %67 = arith.subf %66, %65 : vector<8x512xf32>
    %cst_33 = arith.constant 0.000000e+00 : f32
    %cst_34 = arith.constant 1.000000e+00 : f32
    %68 = vector.broadcast %cst_33 : f32 to vector<8x512xf32>
    %69 = arith.maximumf %68, %67 : vector<8x512xf32>
    %70 = vector.broadcast %cst_34 : f32 to vector<8x512xf32>
    %71 = arith.minimumf %70, %69 : vector<8x512xf32>
    %72 = arith.mulf %18, %71 : vector<8x512xf32>
    %73 = arith.subf %17, %72 : vector<8x512xf32>
    %c1_35 = arith.constant 1 : index
    %c0_36 = arith.constant 0 : index
    %c0_37 = arith.constant 0 : index
    %74 = vector.load %arg2[%c1_35, %c0_36, %c0_37] : memref<3x8x512xf32, #tpu.memory_space<vmem>>, vector<1x8x512xf32>
    %75 = vector.shape_cast %74 : vector<1x8x512xf32> to vector<8x512xf32>
    %76 = vector.shape_cast %73 : vector<8x512xf32> to vector<1x8x512xf32>
    tpu.vector_store %arg2[%c1_35, %c0_36, %c0_37], %76 {strides = array<i32>} : memref<3x8x512xf32, #tpu.memory_space<vmem>>, vector<1x8x512xf32>,
    %cst_38 = arith.constant 1.000000e+00 : f32
    %77 = vector.broadcast %cst_38 : f32 to vector<8x512xf32>
    %78 = arith.addf %34, %77 : vector<8x512xf32>
    %cst_39 = arith.constant 6.000000e+00 : f32
    %79 = vector.broadcast %cst_39 : f32 to vector<8x512xf32>
    %80 = arith.cmpf oge, %78, %79 : vector<8x512xf32>
    %cst_40 = arith.constant 6.000000e+00 : f32
    %81 = vector.broadcast %cst_40 : f32 to vector<8x512xf32>
    %82 = arith.subf %78, %81 : vector<8x512xf32>
    %83 = arith.select %80, %82, %78 : vector<8x512xi1>, vector<8x512xf32>
    %cst_41 = arith.constant 2.000000e+00 : f32
    %84 = vector.broadcast %cst_41 : f32 to vector<8x512xf32>
    %85 = arith.subf %83, %84 : vector<8x512xf32>
    %86 = math.absf %85 : vector<8x512xf32>
    %cst_42 = arith.constant 2.000000e+00 : f32
    %87 = vector.broadcast %cst_42 : f32 to vector<8x512xf32>
    %88 = arith.subf %87, %86 : vector<8x512xf32>
    %cst_43 = arith.constant 0.000000e+00 : f32
    %cst_44 = arith.constant 1.000000e+00 : f32
    %89 = vector.broadcast %cst_43 : f32 to vector<8x512xf32>
    %90 = arith.maximumf %89, %88 : vector<8x512xf32>
    %91 = vector.broadcast %cst_44 : f32 to vector<8x512xf32>
    %92 = arith.minimumf %91, %90 : vector<8x512xf32>
    %93 = arith.mulf %18, %92 : vector<8x512xf32>
    %94 = arith.subf %17, %93 : vector<8x512xf32>
    %c2_45 = arith.constant 2 : index
    %c0_46 = arith.constant 0 : index
    %c0_47 = arith.constant 0 : index
    %95 = vector.load %arg2[%c2_45, %c0_46, %c0_47] : memref<3x8x512xf32, #tpu.memory_space<vmem>>, vector<1x8x512xf32>
    %96 = vector.shape_cast %95 : vector<1x8x512xf32> to vector<8x512xf32>
    %97 = vector.shape_cast %94 : vector<8x512xf32> to vector<1x8x512xf32>
    tpu.vector_store %arg2[%c2_45, %c0_46, %c0_47], %97 {strides = array<i32>} : memref<3x8x512xf32, #tpu.memory_space<vmem>>, vector<1x8x512xf32>,
    return
  }
  func.func @transform_0(%arg0: i32) -> (i32, i32, i32, i32) {
    %c0_i32 = arith.constant 0 : i32
    %c0_i32_0 = arith.constant 0 : i32
    %c0_i32_1 = arith.constant 0 : i32
    %c0_i32_2 = arith.constant 0 : i32
    return %c0_i32, %c0_i32_0, %arg0, %c0_i32_1 : i32, i32, i32, i32
  }
  func.func @transform_1(%arg0: i32) -> (i32, i32, i32) {
    %c0_i32 = arith.constant 0 : i32
    %c0_i32_0 = arith.constant 0 : i32
    %c0_i32_1 = arith.constant 0 : i32
    return %c0_i32, %arg0, %c0_i32_0 : i32, i32, i32
  }
}

</mosaic_0001>

<bundles_post_ra>
// kernel: tpu_custom_call.1
= control target key start
LH: loop header
LB: loop body
LE: loop exit
PB: predicated region body
PF: predicated region fallthrough
CT: control target
= control target key end

     0   :  { %6 = vsyncpa [#allocation3], 0  ;;  %s535_s0 = inlined_call_operand.hbm [shape: f32[2,3,8,512], index: 0, kind: input, shape index: {}]   ;;  %s536_s1 = inlined_call_operand.hbm [shape: f32[3,8,512], index: 1, kind: output, shape index: {}]  }
   0x1   :  { %7 = vsyncpa [#allocation4], 0  ;;  %s400_s6 = smov [#allocation2]   ;;  %s352_s10 = scalar_lea.hbm %s535_s0, 1536 }
   0x2   :  { %s13_s7 = sshll.u32 %s400_s6, 4  ;;  %p353_p0 = scmp.ne.s32.totalorder %s535_s0, %s352_s10  ;;  %s14_s7 = int_to_ptr.vmem [resolvable:$true] %s13_s7 }
   0x3   :  { %s354_s15 = scalar_lea.hbm %s535_s0, 3072  ;;  %p356_p2 = scmp.lt.u32.totalorder %s352_s10, %s535_s0 }
   0x4   :  { %p355_p1 = scmp.lt.u32.totalorder %s354_s15, %s352_s10 }
   0x6   :  { %p357_p3 = por %p356_p2, %p355_p1 }
   0x8   :  { %p358_p4 = pnand %p357_p3, %p353_p0 }
   0xa   :  { %361 = shalt.err (!%p358_p4)
}
   0xb   :  { %s362_s18 = scalar_lea.vmem %s14_s7, 1536  ;;  %p367_p6 = scmp.lt.s32.totalorder %s14_s7, %s14_s7 }
   0xc   :  { %p363_p5 = scmp.ne.s32.totalorder %s14_s7, %s362_s18  ;;  %p368_p7 = scmp.lt.s32.totalorder %s362_s18, %s362_s18 }
   0xe   :  { %p369_p8 = por %p368_p7, %p367_p6 }
  0x10   :  { %p370_p9 = pnand %p369_p8, %p363_p5 }
  0x12   :  { %373 = shalt.err (!%p370_p9)
}
  0x13   :  { %s401_s19 = smov 512   ;;  %s402_s20 = smov 32  }
  0x14   :  { %19 = dma.hbm_to_vmem [thread:$0]  %s535_s0, 1536, %s14_s7, [#allocation3], %s401_s19, %s401_s19, %s402_s20  }
  0x15   :  { %396 = dma.done.wait [#allocation3], 1536  }
  0x16   :  { %397 = vsyncadd [#allocation3], 4294965760  ;;  %v23_v0 = vld [vmem:[#allocation2] sm:$0xff]  ;;  %v24_v4 = vld [vmem:[#allocation2 + $0x8] sm:$0xff]  ;;  %s403_s0 = smov [#allocation5]  }
  0x17   :  { %v37_v1 = vld [vmem:[#allocation2 + $0x40] sm:$0xff]  ;;  %v77_v3 = vmul.f32 6.0, %v23_v0  ;;  %v38_v5 = vld [vmem:[#allocation2 + $0x48] sm:$0xff]  ;;  %v432_v6 = vmul.f32 6.0, %v24_v4  ;;  %v25_v7 = vld [vmem:[#allocation2 + $0x10] sm:$0xff]  ;;  %s296_s23 = sshll.u32 %s403_s0, 4  ;;  %s297_s23 = int_to_ptr.vmem [resolvable:$true] %s296_s23 }
  0x18   :  { %v41_v2 = vmax.f32 %v37_v1, 0.0  ;;  %v42_v10 = vmax.f32 %v38_v5, 0.0  ;;  %v39_v11 = vld [vmem:[#allocation2 + $0x50] sm:$0xff]  ;;  %v435_v17 = vmul.f32 6.0, %v25_v7  ;;  %v40_v20 = vld [vmem:[#allocation2 + $0x58] sm:$0xff]  ;;  %v28_v27 = vld [vmem:[#allocation2 + $0x20] sm:$0xff]  ;;  %p379_p11 = scmp.lt.s32.totalorder %s297_s23, %s297_s23 }
  0x19   :  { %v81_v9 = vand.u32 2147483647, %v77_v3  ;;  %v92_v12 = vand.u32 2147483647, %v432_v6  ;;  %v43_v13 = vmax.f32 %v39_v11, 0.0  ;;  %v26_v24 = vld [vmem:[#allocation2 + $0x18] sm:$0xff] }
  0x1a   :  { %v45_v8 = vmin.f32 %v41_v2, 1.0  ;;  %v46_v16 = vmin.f32 %v42_v10, 1.0  ;;  %v103_v23 = vand.u32 2147483647, %v435_v17  ;;  %v29_v29 = vld [vmem:[#allocation2 + $0x28] sm:$0xff]  ;;  %v44_v31 = vmax.f32 %v40_v20, 0.0 }
  0x1b   :  { %v83_v15 = vmul.f32 0.16666667, %v81_v9  ;;  %v94_v18 = vmul.f32 0.16666667, %v92_v12  ;;  %v47_v19 = vmin.f32 %v43_v13, 1.0  ;;  %v438_v33 = vmul.f32 6.0, %v26_v24 }
  0x1c   :  { %v49_v14 = vmax.f32 %v45_v8, 1e-30  ;;  %v50_v22 = vmax.f32 %v46_v16, 1e-30  ;;  %v105_v30 = vmul.f32 0.16666667, %v103_v23 }
  0x1d   :  { %v84_v21 = vfloor.f32 %v83_v15  ;;  %v95_v25 = vfloor.f32 %v94_v18  ;;  %v51_v26 = vmax.f32 %v47_v19, 1e-30  ;;  %v48_v36 = vmin.f32 %v44_v31, 1.0  ;;  %v30_v42 = vld [vmem:[#allocation2 + $0x30] sm:$0xff]  ;;  %v31_v47 = vld [vmem:[#allocation2 + $0x38] sm:$0xff]  ;;  %s374_s24 = scalar_lea.vmem %s297_s23, 1536 }
  0x1e   :  { %336 = vlog2.f32 %v49_v14  ;;  %v106_v35 = vfloor.f32 %v105_v30  ;;  %v440_v37 = vmul.f32 0.6, %v28_v27  ;;  %v442_v38 = vmul.f32 0.6, %v29_v29  ;;  %p375_p10 = scmp.ne.s32.totalorder %s297_s23, %s374_s24  ;;  %p380_p12 = scmp.lt.s32.totalorder %s374_s24, %s374_s24 }
  0x1f   :  { %v85_v28 = vmul.f32 6.0, %v84_v21  ;;  %338 = vlog2.f32 %v50_v22  ;;  %v96_v32 = vmul.f32 6.0, %v95_v25  ;;  %v114_v40 = vand.u32 2147483647, %v438_v33 }
  0x20   :  { %340 = vlog2.f32 %v51_v26  ;;  %v90_v41 = vand.u32 2147483648, %v77_v3  ;;  %v107_v43 = vmul.f32 6.0, %v106_v35  ;;  %v52_v44 = vmax.f32 %v48_v36, 1e-30  ;;  %p381_p13 = por %p380_p12, %p379_p11 }
  0x21   :  { %v86_v34 = vsub.f32 %v81_v9, %v85_v28  ;;  %v97_v39 = vsub.f32 %v92_v12, %v96_v32  ;;  %v101_v46 = vand.u32 2147483648, %v432_v6  ;;  %v116_v48 = vmul.f32 0.16666667, %v114_v40 }
  0x22   :  { %v108_v51 = vsub.f32 %v103_v23, %v107_v43  ;;  %342 = vlog2.f32 %v52_v44  ;;  %v446_v53 = vmul.f32 0.6, %v30_v42  ;;  %v112_v54 = vand.u32 2147483648, %v435_v17  ;;  %p382_p0 = pnand %p381_p13, %p375_p10 }
  0x23   :  { %vm87_vm0 = vcmp.eq.f32.partialorder %v86_v34, 6.0  ;;  %vm98_vm1 = vcmp.eq.f32.partialorder %v97_v39, 6.0  ;;  %v117_v55 = vfloor.f32 %v116_v48  ;;  %v449_v58 = vmul.f32 0.6, %v31_v47 }
  0x24   :  { %v88_v45 = vsel %vm87_vm0, 0.0, %v86_v34  ;;  %v99_v50 = vsel %vm98_vm1, 0.0, %v97_v39  ;;  %vm109_vm2 = vcmp.eq.f32.partialorder %v108_v51, 6.0  ;;  %v123_v59 = vand.u32 2147483648, %v438_v33 }
  0x25   :  { %v89_v49 = vand.u32 2147483647, %v88_v45  ;;  %v100_v52 = vand.u32 2147483647, %v99_v50  ;;  %v110_v62 = vsel %vm109_vm2, 0.0, %v108_v51  ;;  %v118_v63 = vmul.f32 6.0, %v117_v55 }
  0x26   :  { %v111_v2 = vand.u32 2147483647, %v110_v62 }
  0x27   :  { %v91_v57 = vor.u32 %v90_v41, %v89_v49  ;;  %v102_v61 = vor.u32 %v101_v46, %v100_v52  ;;  %v119_v13 = vsub.f32 %v114_v40, %v118_v63 }
  0x28   :  { %v337_v56 = vpop.eup %336  ;;  %v113_v9 = vor.u32 %v112_v54, %v111_v2 }
  0x29   :  { %v54_v60 = vmul.f32 0.6931472, %v337_v56  ;;  %v339_v0 = vpop.eup %338  ;;  %vm125_vm3 = vcmp.ne.f32.partialorder %v91_v57, 0.0  ;;  %vm129_vm4 = vcmp.lt.f32.partialorder %v91_v57, 0.0  ;;  %v137_v1 = vadd.f32 6.0, %v91_v57 }
  0x2a   :  { %v341_v3 = vpop.eup %340  ;;  %vm133_vm5 = vmand %vm129_vm4, %vm125_vm3  ;;  %v56_v5 = vmul.f32 0.6931472, %v339_v0  ;;  %vm126_vm6 = vcmp.ne.f32.partialorder %v102_v61, 0.0  ;;  %vm130_vm7 = vcmp.lt.f32.partialorder %v102_v61, 0.0  ;;  %v138_v7 = vadd.f32 6.0, %v102_v61 }
  0x2b   :  { %v61_v4 = vmul.f32 0.45454547, %v54_v60  ;;  %v452_v6 = vsel %vm133_vm5, %v137_v1, %v91_v57  ;;  %vm134_vm8 = vmand %vm130_vm7, %vm126_vm6  ;;  %v58_v8 = vmul.f32 0.6931472, %v341_v3  ;;  %vm127_vm9 = vcmp.ne.f32.partialorder %v113_v9, 0.0 }
  0x2c   :  { %v145_v11 = vadd.f32 5.0, %v452_v6  ;;  %v62_v12 = vmul.f32 0.45454547, %v56_v5  ;;  %v455_v14 = vsel %vm134_vm8, %v138_v7, %v102_v61  ;;  %vm131_vm10 = vcmp.lt.f32.partialorder %v113_v9, 0.0  ;;  %v343_v18 = vpop.eup %342 }
  0x2d   :  { %v65_v10 = vmul.f32 1.442695, %v61_v4  ;;  %v63_v15 = vmul.f32 0.45454547, %v58_v8  ;;  %v146_v19 = vadd.f32 5.0, %v455_v14  ;;  %vm135_vm12 = vmand %vm131_vm10, %vm127_vm9  ;;  %v139_v21 = vadd.f32 6.0, %v113_v9 }
  0x2e   :  { %vm149_vm11 = vcmp.ge.f32.partialorder %v145_v11, 6.0  ;;  %v308_v16 = vadd.f32 -6.0, %v145_v11  ;;  %v67_v17 = vmul.f32 1.442695, %v62_v12  ;;  %vm120_vm13 = vcmp.eq.f32.partialorder %v119_v13, 6.0 }
  0x2f   :  { %344 = vpow2.f32 %v65_v10  ;;  %v69_v20 = vmul.f32 1.442695, %v63_v15  ;;  %v60_v23 = vmul.f32 0.6931472, %v343_v18  ;;  %v121_v24 = vsel %vm120_vm13, 0.0, %v119_v13 }
  0x30   :  { %v157_v22 = vsel %vm149_vm11, %v308_v16, %v145_v11  ;;  %346 = vpow2.f32 %v67_v17  ;;  %vm150_vm14 = vcmp.ge.f32.partialorder %v146_v19, 6.0  ;;  %v309_v26 = vadd.f32 -6.0, %v146_v19 }
  0x31   :  { %v312_v25 = vadd.f32 -2.0, %v157_v22  ;;  %348 = vpow2.f32 %v69_v20  ;;  %v458_v27 = vsel %vm135_vm12, %v139_v21, %v113_v9  ;;  %v64_v28 = vmul.f32 0.45454547, %v60_v23 }
  0x32   :  { %v122_v29 = vand.u32 2147483647, %v121_v24  ;;  %v193_v30 = vadd.f32 3.0, %v452_v6  ;;  %v158_v32 = vsel %vm150_vm14, %v309_v26, %v146_v19  ;;  %v147_v33 = vadd.f32 5.0, %v458_v27 }
  0x33   :  { %v165_v31 = vand.u32 2147483647, %v312_v25  ;;  %v194_v34 = vadd.f32 3.0, %v455_v14  ;;  %v313_v35 = vadd.f32 -2.0, %v158_v32  ;;  %v71_v36 = vmul.f32 1.442695, %v64_v28 }
  0x34   :  { %v124_v39 = vor.u32 %v123_v59, %v122_v29  ;;  %vm197_vm15 = vcmp.ge.f32.partialorder %v193_v30, 6.0  ;;  %vm151_vm0 = vcmp.ge.f32.partialorder %v147_v33, 6.0  ;;  %v310_v41 = vadd.f32 -6.0, %v147_v33 }
  0x35   :  { %v169_v40 = vsub.f32 2.0, %v165_v31  ;;  %v316_v42 = vadd.f32 -6.0, %v193_v30  ;;  %v166_v43 = vand.u32 2147483647, %v313_v35  ;;  %350 = vpow2.f32 %v71_v36 }
  0x36   :  { %vm128_vm1 = vcmp.ne.f32.partialorder %v124_v39, 0.0  ;;  %vm132_vm2 = vcmp.lt.f32.partialorder %v124_v39, 0.0  ;;  %v159_v45 = vsel %vm151_vm0, %v310_v41, %v147_v33  ;;  %v140_v46 = vadd.f32 6.0, %v124_v39 }
  0x37   :  { %v173_v44 = vmax.f32 %v169_v40, 0.0  ;;  %vm136_vm3 = vmand %vm132_vm2, %vm128_vm1  ;;  %v205_v47 = vsel %vm197_vm15, %v316_v42, %v193_v30  ;;  %v170_v49 = vsub.f32 2.0, %v166_v43  ;;  %v314_v50 = vadd.f32 -2.0, %v159_v45 }
  0x38   :  { %v320_v51 = vadd.f32 -2.0, %v205_v47  ;;  %vm198_vm4 = vcmp.ge.f32.partialorder %v194_v34, 6.0  ;;  %v469_v55 = vsel %vm136_vm3, %v140_v46, %v124_v39  ;;  %v317_v56 = vadd.f32 -6.0, %v194_v34 }
  0x39   :  { %v463_v48 = vpop.eup %344  ;;  %v177_v54 = vmin.f32 %v173_v44, 1.0  ;;  %v174_v59 = vmax.f32 %v170_v49, 0.0  ;;  %v167_v60 = vand.u32 2147483647, %v314_v50  ;;  %v148_v61 = vadd.f32 5.0, %v469_v55 }
  0x3a   :  { %v467_v52 = vmul.f32 %v463_v48, %v440_v37  ;;  %v471_v57 = vpop.eup %346  ;;  %v213_v62 = vand.u32 2147483647, %v320_v51  ;;  %v206_v37 = vsel %vm198_vm4, %v317_v56, %v194_v34  ;;  %v195_v2 = vadd.f32 3.0, %v458_v27 }
  0x3b   :  { %v474_v63 = vpop.eup %348  ;;  %v479_v1 = vmul.f32 %v471_v57, %v442_v38  ;;  %v178_v3 = vmin.f32 %v174_v59, 1.0  ;;  %v171_v5 = vsub.f32 2.0, %v167_v60  ;;  %vm152_vm5 = vcmp.ge.f32.partialorder %v148_v61, 6.0 }
  0x3c   :  { %v181_v0 = vmul.f32 %v177_v54, %v467_v52  ;;  %v484_v4 = vmul.f32 %v474_v63, %v446_v53  ;;  %v311_v8 = vadd.f32 -6.0, %v148_v61  ;;  %v217_v9 = vsub.f32 2.0, %v213_v62 }
  0x3d   :  { %v321_v10 = vadd.f32 -2.0, %v206_v37  ;;  %v182_v11 = vmul.f32 %v178_v3, %v479_v1  ;;  %v175_v12 = vmax.f32 %v171_v5, 0.0  ;;  %vm199_vm6 = vcmp.ge.f32.partialorder %v195_v2, 6.0 }
  0x3e   :  { %v185_v7 = vsub.f32 %v463_v48, %v181_v0  ;;  %v318_v38 = vadd.f32 -6.0, %v195_v2  ;;  %v160_v13 = vsel %vm152_vm5, %v311_v8, %v148_v61  ;;  %v221_v15 = vmax.f32 %v217_v9, 0.0 }
  0x3f   :  { %v214_v16 = vand.u32 2147483647, %v321_v10  ;;  %v196_v17 = vadd.f32 3.0, %v469_v55  ;;  %v489_v53 = vpop.eup %350  ;;  %v186_v18 = vsub.f32 %v471_v57, %v182_v11  ;;  %v179_v19 = vmin.f32 %v175_v12, 1.0 }
  0x40   :  { %189 = vst [vmem:[#allocation5] sm:$0xff] %v185_v7  ;;  %v315_v20 = vadd.f32 -2.0, %v160_v13  ;;  %v207_v21 = vsel %vm199_vm6, %v318_v38, %v195_v2  ;;  %v494_v22 = vmul.f32 %v489_v53, %v449_v58  ;;  %v225_v23 = vmin.f32 %v221_v15, 1.0 }
  0x41   :  { %v218_v24 = vsub.f32 2.0, %v214_v16  ;;  %v322_v25 = vadd.f32 -2.0, %v207_v21  ;;  %190 = vst [vmem:[#allocation5 + $0x8] sm:$0xff] %v186_v18  ;;  %v183_v26 = vmul.f32 %v179_v19, %v484_v4  ;;  %vm200_vm7 = vcmp.ge.f32.partialorder %v196_v17, 6.0 }
  0x42   :  { %v168_v28 = vand.u32 2147483647, %v315_v20  ;;  %v319_v29 = vadd.f32 -6.0, %v196_v17  ;;  %v229_v30 = vmul.f32 %v225_v23, %v467_v52  ;;  %v242_v33 = vadd.f32 1.0, %v452_v6 }
  0x43   :  { %v222_v31 = vmax.f32 %v218_v24, 0.0  ;;  %v215_v32 = vand.u32 2147483647, %v322_v25  ;;  %v187_v34 = vsub.f32 %v474_v63, %v183_v26  ;;  %v243_v36 = vadd.f32 1.0, %v455_v14 }
  0x44   :  { %v172_v35 = vsub.f32 2.0, %v168_v28  ;;  %v208_v58 = vsel %vm200_vm7, %v319_v29, %v196_v17  ;;  %v233_v39 = vsub.f32 %v463_v48, %v229_v30  ;;  %vm246_vm8 = vcmp.ge.f32.partialorder %v242_v33, 6.0 }
  0x45   :  { %v226_v40 = vmin.f32 %v222_v31, 1.0  ;;  %v219_v41 = vsub.f32 2.0, %v215_v32  ;;  %v323_v42 = vadd.f32 -2.0, %v208_v58  ;;  %191 = vst [vmem:[#allocation5 + $0x10] sm:$0xff] %v187_v34  ;;  %v324_v44 = vadd.f32 -6.0, %v242_v33 }
  0x46   :  { %v176_v43 = vmax.f32 %v172_v35, 0.0  ;;  %vm247_vm9 = vcmp.ge.f32.partialorder %v243_v36, 6.0  ;;  %238 = vst [vmem:[#allocation5 + $0x20] sm:$0xff] %v233_v39  ;;  %v325_v47 = vadd.f32 -6.0, %v243_v36  ;;  %v244_v14 = vadd.f32 1.0, %v458_v27 }
  0x47   :  { %v230_v45 = vmul.f32 %v226_v40, %v479_v1  ;;  %v223_v6 = vmax.f32 %v219_v41, 0.0  ;;  %v216_v46 = vand.u32 2147483647, %v323_v42  ;;  %v254_v50 = vsel %vm246_vm8, %v324_v44, %v242_v33 }
  0x48   :  { %v180_v49 = vmin.f32 %v176_v43, 1.0  ;;  %v245_v51 = vadd.f32 1.0, %v469_v55  ;;  %v328_v60 = vadd.f32 -2.0, %v254_v50  ;;  %v255_v62 = vsel %vm247_vm9, %v325_v47, %v243_v36 }
  0x49   :  { %v234_v54 = vsub.f32 %v471_v57, %v230_v45  ;;  %v227_v56 = vmin.f32 %v223_v6, 1.0  ;;  %v220_v59 = vsub.f32 2.0, %v216_v46  ;;  %vm248_vm10 = vcmp.ge.f32.partialorder %v244_v14, 6.0 }
  0x4a   :  { %v184_v61 = vmul.f32 %v180_v49, %v494_v22  ;;  %v326_v0 = vadd.f32 -6.0, %v244_v14  ;;  %v262_v3 = vand.u32 2147483647, %v328_v60  ;;  %v329_v5 = vadd.f32 -2.0, %v255_v62 }
  0x4b   :  { %239 = vst [vmem:[#allocation5 + $0x28] sm:$0xff] %v234_v54  ;;  %v231_v37 = vmul.f32 %v227_v56, %v484_v4  ;;  %v224_v2 = vmax.f32 %v220_v59, 0.0  ;;  %vm249_vm11 = vcmp.ge.f32.partialorder %v245_v51, 6.0  ;;  %v327_v55 = vadd.f32 -6.0, %v245_v51 }
  0x4c   :  { %v188_v27 = vsub.f32 %v489_v53, %v184_v61  ;;  %v256_v7 = vsel %vm248_vm10, %v326_v0, %v244_v14  ;;  %v266_v10 = vsub.f32 2.0, %v262_v3  ;;  %v263_v11 = vand.u32 2147483647, %v329_v5 }
  0x4d   :  { %v235_v8 = vsub.f32 %v474_v63, %v231_v37  ;;  %v228_v9 = vmin.f32 %v224_v2, 1.0  ;;  %v330_v12 = vadd.f32 -2.0, %v256_v7  ;;  %v257_v38 = vsel %vm249_vm11, %v327_v55, %v245_v51 }
  0x4e   :  { %192 = vst [vmem:[#allocation5 + $0x18] sm:$0xff] %v188_v27  ;;  %v270_v15 = vmax.f32 %v266_v10, 0.0  ;;  %v267_v16 = vsub.f32 2.0, %v263_v11  ;;  %v331_v17 = vadd.f32 -2.0, %v257_v38 }
  0x4f   :  { %240 = vst [vmem:[#allocation5 + $0x30] sm:$0xff] %v235_v8  ;;  %v232_v13 = vmul.f32 %v228_v9, %v494_v22  ;;  %v264_v18 = vand.u32 2147483647, %v330_v12 }
  0x50   :  { %v274_v20 = vmin.f32 %v270_v15, 1.0  ;;  %v271_v21 = vmax.f32 %v267_v16, 0.0  ;;  %v265_v23 = vand.u32 2147483647, %v331_v17 }
  0x51   :  { %v236_v19 = vsub.f32 %v489_v53, %v232_v13  ;;  %v268_v24 = vsub.f32 2.0, %v264_v18 }
  0x52   :  { %v278_v25 = vmul.f32 %v274_v20, %v467_v52  ;;  %v275_v26 = vmin.f32 %v271_v21, 1.0  ;;  %v269_v28 = vsub.f32 2.0, %v265_v23 }
  0x53   :  { %241 = vst [vmem:[#allocation5 + $0x38] sm:$0xff] %v236_v19  ;;  %v272_v29 = vmax.f32 %v268_v24, 0.0 }
  0x54   :  { %v282_v30 = vsub.f32 %v463_v48, %v278_v25  ;;  %v279_v31 = vmul.f32 %v275_v26, %v479_v1  ;;  %v273_v32 = vmax.f32 %v269_v28, 0.0 }
  0x55   :  { %v276_v33 = vmin.f32 %v272_v29, 1.0 }
  0x56   :  { %287 = vst [vmem:[#allocation5 + $0x40] sm:$0xff] %v282_v30  ;;  %v283_v34 = vsub.f32 %v471_v57, %v279_v31  ;;  %v277_v35 = vmin.f32 %v273_v32, 1.0 }
  0x57   :  { %v280_v58 = vmul.f32 %v276_v33, %v484_v4 }
  0x58   :  { %288 = vst [vmem:[#allocation5 + $0x48] sm:$0xff] %v283_v34  ;;  %v281_v52 = vmul.f32 %v277_v35, %v494_v22 }
  0x59   :  { %v284_v36 = vsub.f32 %v474_v63, %v280_v58 }
  0x5a   :  { %v285_v39 = vsub.f32 %v489_v53, %v281_v52 }
  0x5b   :  { %289 = vst [vmem:[#allocation5 + $0x50] sm:$0xff] %v284_v36 }
  0x5c   :  { %290 = vst [vmem:[#allocation5 + $0x58] sm:$0xff] %v285_v39 }
  0x5d   :  { %385 = shalt.err (!%p382_p0)
}
  0x5e   :  { %s386_s27 = scalar_lea.hbm %s536_s1, 1536 }
  0x5f   :  { %p387_p1 = scmp.ne.s32.totalorder %s536_s1, %s386_s27  ;;  %p390_p2 = scmp.lt.u32.totalorder %s386_s27, %s536_s1 }
  0x61   :  { %p392_p3 = pnand %p390_p2, %p387_p1 }
  0x63   :  { %395 = shalt.err (!%p392_p3)
}
  0x64   :  { %302 = dma.vmem_to_hbm [thread:$0]  %s297_s23, 1536, %s536_s1, [#allocation4], %s401_s19, %s401_s19, %s402_s20  }
  0x65   :  { %398 = dma.done.wait [#allocation4], 1536  }
  0x66   :  { %399 = vsyncadd [#allocation4], 4294965760 }
  0x67   :  { %306 = vsyncpa [#allocation3], 1 }
  0x68   :  { %307 = vsyncpa [#allocation4], 1 }

</bundles_post_ra>
